<compile_context>
chip_gen: v7x
topology: tpu7x:2x2x1
jax: 0.10.0
libtpu: 0.0.40
codegen_flags: <defaults>
</compile_context>

<pallas_src>
import jax
import jax.numpy as jnp
from jax.experimental import pallas as pl
from jax.experimental.pallas import tpu as pltpu


def _window_matrix(shape, coarse_axis, scale, val):
    """Selection matrix: `val` where the fine index lies in the scale-wide window
    of the coarse index, else 0. Built with iota + compares (no integer div)."""
    rows = jax.lax.broadcasted_iota(jnp.int32, shape, 0)
    cols = jax.lax.broadcasted_iota(jnp.int32, shape, 1)
    coarse, fine = (rows, cols) if coarse_axis == 0 else (cols, rows)
    lo = coarse * scale
    inside = (fine >= lo) & (fine < lo + scale)
    return jnp.where(inside, jnp.float32(val), jnp.float32(0.0))


def _make_kernel(Bt, H, W, Hs, Ws, scale):
    inv_255_scale = 1.0 / (255.0 * scale)   # grayscale /255 folded into H pooling
    inv_scale = 1.0 / scale
    stack_w_contraction = (Bt > 1) and (H % 8 == 0)   # leading-dim collapse is layout-free

    def kernel(x_ref, recon_ref, mu_ref):
        # Constant pooling / upsampling matrices, built in-register each step
        # (tiny: O((H+W)*scale-free) elements; rebuild hidden under block DMA).
        ph = _window_matrix((Hs, H), 0, scale, inv_255_scale)   # (Hs, H)
        pw = _window_matrix((W, Ws), 1, scale, inv_scale)       # (W, Ws)
        uh = _window_matrix((H, Hs), 1, scale, 1.0)             # (H, Hs)
        uw = _window_matrix((Ws, W), 0, scale, 1.0)             # (Ws, W)

        # --- grayscale (torchvision PIL round-trip emulated arithmetically) ---
        #   to_pil_image: float -> uint8 via mul(255).byte()  (truncation)
        #   to_grayscale: L = (19595*R + 38470*G + 7471*B) >> 16 (truncation)
        #   to_tensor:    uint8 -> float / 255   (folded into `ph`)
        # All intermediates stay < 2^24 so f32 arithmetic is exact.
        r8 = jnp.floor(x_ref[:, 0] * 255.0)                     # (Bt, H, W)
        g8 = jnp.floor(x_ref[:, 1] * 255.0)
        b8 = jnp.floor(x_ref[:, 2] * 255.0)
        gray8 = jnp.floor(
            (19595.0 * r8 + 38470.0 * g8 + 7471.0 * b8) * (1.0 / 65536.0))

        # --- W-axis pooling ---
        if stack_w_contraction:
            # Stack the batch block into one wide contraction (M = Bt*H).
            tmp = jnp.dot(gray8.reshape(Bt * H, W), pw,
                          preferred_element_type=jnp.float32)   # (Bt*H, Ws)
            tmp_rows = [tmp[b * H:(b + 1) * H] for b in range(Bt)]
        else:
            tmp_rows = [jnp.dot(gray8[b], pw,
                                preferred_element_type=jnp.float32)
                        for b in range(Bt)]                      # Bt x (H, Ws)

        for b in range(Bt):
            # H-axis pooling: avg_pool2d(gray, scale, scale) / 255
            pooled = jnp.dot(ph, tmp_rows[b],
                             preferred_element_type=jnp.float32)        # (Hs, Ws)
            mu_ref[b] = pooled

            # F.interpolate(z, (H, W), mode='nearest')  ==  Uh @ pooled @ Uw
            up = jnp.dot(uh,
                         jnp.dot(pooled, uw, preferred_element_type=jnp.float32),
                         preferred_element_type=jnp.float32)            # (H, W)

            # torch.cat([up, up, up], dim=1) — per-channel stores, no broadcast
            for c in range(3):
                recon_ref[b, c] = up

    return kernel


def _choose_block_batch(B, H, W, Hs, Ws, vmem_budget_bytes=4 << 20):
    """Largest Bt dividing B such that one copy of the in+out blocks fits the
    budget, keeping >=2 grid steps so megacore (v7x) gets work on both cores."""
    per_elem = 4 * (3 * H * W + 3 * H * W + Hs * Ws)   # x + recon + mu, f32
    bt = max(1, min(B, vmem_budget_bytes // per_elem))
    if B >= 2:
        bt = min(bt, B // 2)
    bt = max(bt, 1)
    while B % bt:
        bt -= 1
    return bt


def downsample_encoder_forward(x, scale, *, block_batch=None):
    """Returns (recon, mu, logvar) exactly like downsample_encoder.forward."""
    B, C, H, W = x.shape
    assert C == 3 and H % scale == 0 and W % scale == 0
    Hs, Ws = H // scale, W // scale

    Bt = _choose_block_batch(B, H, W, Hs, Ws) if block_batch is None else block_batch
    assert B % Bt == 0
    num_steps = B // Bt

    # Explicit scoped-VMEM limit: double-buffered blocks + generous headroom,
    # capped so it also fits v7x's 64 MiB physical VMEM per TensorCore.
    block_bytes = 4 * Bt * (3 * H * W + 3 * H * W + Hs * Ws)
    vmem_limit = int(min(64 << 20, max(8 << 20, 3 * block_bytes)))

    flops = int(B * (8 * 3 * H * W            # grayscale elementwise
                     + 2 * H * W * Ws         # W pooling matmul
                     + 2 * Hs * H * Ws        # H pooling matmul
                     + 2 * Hs * Ws * W        # W upsample matmul
                     + 2 * H * Hs * W))       # H upsample matmul
    bytes_accessed = int(4 * B * (3 * H * W + 3 * H * W + Hs * Ws))

    recon, mu3 = pl.pallas_call(
        _make_kernel(Bt, H, W, Hs, Ws, scale),
        out_shape=(
            jax.ShapeDtypeStruct((B, 3, H, W), jnp.float32),
            jax.ShapeDtypeStruct((B, Hs, Ws), jnp.float32),
        ),
        grid=(num_steps,),
        in_specs=[pl.BlockSpec((Bt, 3, H, W), lambda i: (i, 0, 0, 0))],
        out_specs=(
            pl.BlockSpec((Bt, 3, H, W), lambda i: (i, 0, 0, 0)),
            pl.BlockSpec((Bt, Hs, Ws), lambda i: (i, 0, 0)),
        ),
        compiler_params=pltpu.CompilerParams(
            dimension_semantics=("parallel",),
            vmem_limit_bytes=vmem_limit),
        cost_estimate=pl.CostEstimate(
            flops=flops, transcendentals=0, bytes_accessed=bytes_accessed),
    )(x)

    mu = mu3.reshape(B, 1, Hs, Ws)
    logvar = jnp.zeros_like(mu)
    return recon, mu, logvar


def _reference(x, scale):
    """Pure-JAX reference (same uint8/grayscale quantization emulation)."""
    B, C, H, W = x.shape
    Hs, Ws = H // scale, W // scale
    x8 = jnp.floor(x * 255.0)
    gray8 = jnp.floor(
        (19595.0 * x8[:, 0] + 38470.0 * x8[:, 1] + 7471.0 * x8[:, 2]) / 65536.0)
    gray = gray8 / 255.0                                                   # (B, H, W)
    mu = gray.reshape(B, Hs, scale, Ws, scale).mean(axis=(2, 4))[:, None]  # (B,1,Hs,Ws)
    up = jnp.repeat(jnp.repeat(mu, scale, axis=2), scale, axis=3)          # (B,1,H,W)
    recon = jnp.concatenate([up, up, up], axis=1)                          # (B,3,H,W)
    return recon, mu, jnp.zeros_like(mu)


if __name__ == "__main__":
    # Small shapes consistent with the module: image_size=(W=128, H=64), scale=8.
    # B=4 so the batch-coarsened grid path (Bt=2, 2 parallel grid steps, stacked
    # W-contraction) is exercised.
    B, H, W, SCALE = 4, 64, 128, 8
    key = jax.random.PRNGKey(0)
    x = jax.random.uniform(key, (B, 3, H, W), dtype=jnp.float32)  # images in [0,1)

    recon, mu, logvar = downsample_encoder_forward(x, SCALE)
    jax.block_until_ready((recon, mu, logvar))

    recon_exp, mu_exp, logvar_exp = _reference(x, SCALE)
    assert recon.shape == (B, 3, H, W)
    assert mu.shape == (B, 1, H // SCALE, W // SCALE)
    assert jnp.allclose(mu, mu_exp, atol=1e-5)
    assert jnp.allclose(recon, recon_exp, atol=1e-5)
    assert jnp.allclose(logvar, logvar_exp)

    print("KERNEL_OK")
</pallas_src>

<mosaic_0001>
module attributes {stable_mosaic.version = 11 : i64} {
  func.func @kernel(%arg0: i32, %arg1: memref<2x3x64x128xf32, #tpu.memory_space<vmem>>, %arg2: memref<2x3x64x128xf32, #tpu.memory_space<vmem>>, %arg3: memref<2x8x16xf32, #tpu.memory_space<vmem>>) attributes {dimension_semantics = [#tpu.dimension_semantics<parallel>], iteration_bounds = array<i64: 2>, scalar_prefetch = 0 : i64, scratch_operands = 0 : i64, tpu.core_type = #tpu.core_type<tc>, window_params = [{transform_indices = @transform_0, window_bounds = array<i64: 2, 3, 64, 128>}, {transform_indices = @transform_1, window_bounds = array<i64: 2, 3, 64, 128>}, {transform_indices = @transform_2, window_bounds = array<i64: 2, 8, 16>}]} {
    %0 = tpu.iota {dimensions = array<i32: 0>} : vector<8x64xi32>
    %1 = tpu.iota {dimensions = array<i32: 1>} : vector<8x64xi32>
    %c8_i32 = arith.constant 8 : i32
    %2 = vector.broadcast %c8_i32 : i32 to vector<8x64xi32>
    %3 = arith.muli %0, %2 : vector<8x64xi32>
    %4 = arith.cmpi sge, %1, %3 : vector<8x64xi32>
    %c8_i32_0 = arith.constant 8 : i32
    %5 = vector.broadcast %c8_i32_0 : i32 to vector<8x64xi32>
    %6 = arith.addi %3, %5 : vector<8x64xi32>
    %7 = arith.cmpi slt, %1, %6 : vector<8x64xi32>
    %8 = arith.andi %4, %7 : vector<8x64xi1>
    %cst = arith.constant 4.90196107E-4 : f32
    %cst_1 = arith.constant 0.000000e+00 : f32
    %9 = vector.broadcast %cst : f32 to vector<8x64xf32>
    %10 = vector.broadcast %cst_1 : f32 to vector<8x64xf32>
    %11 = arith.select %8, %9, %10 : vector<8x64xi1>, vector<8x64xf32>
    %12 = tpu.iota {dimensions = array<i32: 0>} : vector<128x16xi32>
    %13 = tpu.iota {dimensions = array<i32: 1>} : vector<128x16xi32>
    %c8_i32_2 = arith.constant 8 : i32
    %14 = vector.broadcast %c8_i32_2 : i32 to vector<128x16xi32>
    %15 = arith.muli %13, %14 : vector<128x16xi32>
    %16 = arith.cmpi sge, %12, %15 : vector<128x16xi32>
    %c8_i32_3 = arith.constant 8 : i32
    %17 = vector.broadcast %c8_i32_3 : i32 to vector<128x16xi32>
    %18 = arith.addi %15, %17 : vector<128x16xi32>
    %19 = arith.cmpi slt, %12, %18 : vector<128x16xi32>
    %20 = arith.andi %16, %19 : vector<128x16xi1>
    %cst_4 = arith.constant 1.250000e-01 : f32
    %cst_5 = arith.constant 0.000000e+00 : f32
    %21 = vector.broadcast %cst_4 : f32 to vector<128x16xf32>
    %22 = vector.broadcast %cst_5 : f32 to vector<128x16xf32>
    %23 = arith.select %20, %21, %22 : vector<128x16xi1>, vector<128x16xf32>
    %24 = tpu.iota {dimensions = array<i32: 0>} : vector<64x8xi32>
    %25 = tpu.iota {dimensions = array<i32: 1>} : vector<64x8xi32>
    %c8_i32_6 = arith.constant 8 : i32
    %26 = vector.broadcast %c8_i32_6 : i32 to vector<64x8xi32>
    %27 = arith.muli %25, %26 : vector<64x8xi32>
    %28 = arith.cmpi sge, %24, %27 : vector<64x8xi32>
    %c8_i32_7 = arith.constant 8 : i32
    %29 = vector.broadcast %c8_i32_7 : i32 to vector<64x8xi32>
    %30 = arith.addi %27, %29 : vector<64x8xi32>
    %31 = arith.cmpi slt, %24, %30 : vector<64x8xi32>
    %32 = arith.andi %28, %31 : vector<64x8xi1>
    %cst_8 = arith.constant 1.000000e+00 : f32
    %cst_9 = arith.constant 0.000000e+00 : f32
    %33 = vector.broadcast %cst_8 : f32 to vector<64x8xf32>
    %34 = vector.broadcast %cst_9 : f32 to vector<64x8xf32>
    %35 = arith.select %32, %33, %34 : vector<64x8xi1>, vector<64x8xf32>
    %36 = tpu.iota {dimensions = array<i32: 0>} : vector<16x128xi32>
    %37 = tpu.iota {dimensions = array<i32: 1>} : vector<16x128xi32>
    %c8_i32_10 = arith.constant 8 : i32
    %38 = vector.broadcast %c8_i32_10 : i32 to vector<16x128xi32>
    %39 = arith.muli %36, %38 : vector<16x128xi32>
    %40 = arith.cmpi sge, %37, %39 : vector<16x128xi32>
    %c8_i32_11 = arith.constant 8 : i32
    %41 = vector.broadcast %c8_i32_11 : i32 to vector<16x128xi32>
    %42 = arith.addi %39, %41 : vector<16x128xi32>
    %43 = arith.cmpi slt, %37, %42 : vector<16x128xi32>
    %44 = arith.andi %40, %43 : vector<16x128xi1>
    %cst_12 = arith.constant 1.000000e+00 : f32
    %cst_13 = arith.constant 0.000000e+00 : f32
    %45 = vector.broadcast %cst_12 : f32 to vector<16x128xf32>
    %46 = vector.broadcast %cst_13 : f32 to vector<16x128xf32>
    %47 = arith.select %44, %45, %46 : vector<16x128xi1>, vector<16x128xf32>
    %c0 = arith.constant 0 : index
    %c0_14 = arith.constant 0 : index
    %c0_15 = arith.constant 0 : index
    %c0_16 = arith.constant 0 : index
    %48 = vector.load %arg1[%c0, %c0_14, %c0_15, %c0_16] : memref<2x3x64x128xf32, #tpu.memory_space<vmem>>, vector<2x1x64x128xf32>
    %49 = vector.shape_cast %48 : vector<2x1x64x128xf32> to vector<2x64x128xf32>
    %cst_17 = arith.constant 2.550000e+02 : f32
    %50 = vector.broadcast %cst_17 : f32 to vector<2x64x128xf32>
    %51 = arith.mulf %49, %50 : vector<2x64x128xf32>
    %52 = math.floor %51 : vector<2x64x128xf32>
    %c0_18 = arith.constant 0 : index
    %c1 = arith.constant 1 : index
    %c0_19 = arith.constant 0 : index
    %c0_20 = arith.constant 0 : index
    %53 = vector.load %arg1[%c0_18, %c1, %c0_19, %c0_20] : memref<2x3x64x128xf32, #tpu.memory_space<vmem>>, vector<2x1x64x128xf32>
    %54 = vector.shape_cast %53 : vector<2x1x64x128xf32> to vector<2x64x128xf32>
    %cst_21 = arith.constant 2.550000e+02 : f32
    %55 = vector.broadcast %cst_21 : f32 to vector<2x64x128xf32>
    %56 = arith.mulf %54, %55 : vector<2x64x128xf32>
    %57 = math.floor %56 : vector<2x64x128xf32>
    %c0_22 = arith.constant 0 : index
    %c2 = arith.constant 2 : index
    %c0_23 = arith.constant 0 : index
    %c0_24 = arith.constant 0 : index
    %58 = vector.load %arg1[%c0_22, %c2, %c0_23, %c0_24] : memref<2x3x64x128xf32, #tpu.memory_space<vmem>>, vector<2x1x64x128xf32>
    %59 = vector.shape_cast %58 : vector<2x1x64x128xf32> to vector<2x64x128xf32>
    %cst_25 = arith.constant 2.550000e+02 : f32
    %60 = vector.broadcast %cst_25 : f32 to vector<2x64x128xf32>
    %61 = arith.mulf %59, %60 : vector<2x64x128xf32>
    %62 = math.floor %61 : vector<2x64x128xf32>
    %cst_26 = arith.constant 1.959500e+04 : f32
    %63 = vector.broadcast %cst_26 : f32 to vector<2x64x128xf32>
    %64 = arith.mulf %63, %52 : vector<2x64x128xf32>
    %cst_27 = arith.constant 3.847000e+04 : f32
    %65 = vector.broadcast %cst_27 : f32 to vector<2x64x128xf32>
    %66 = arith.mulf %65, %57 : vector<2x64x128xf32>
    %67 = arith.addf %64, %66 : vector<2x64x128xf32>
    %cst_28 = arith.constant 7.471000e+03 : f32
    %68 = vector.broadcast %cst_28 : f32 to vector<2x64x128xf32>
    %69 = arith.mulf %68, %62 : vector<2x64x128xf32>
    %70 = arith.addf %67, %69 : vector<2x64x128xf32>
    %cst_29 = arith.constant 1.52587891E-5 : f32
    %71 = vector.broadcast %cst_29 : f32 to vector<2x64x128xf32>
    %72 = arith.mulf %70, %71 : vector<2x64x128xf32>
    %73 = math.floor %72 : vector<2x64x128xf32>
    %74 = vector.shape_cast %73 : vector<2x64x128xf32> to vector<128x128xf32>
    %cst_30 = arith.constant dense<0.000000e+00> : vector<128x16xf32>
    %75 = tpu.matmul %74, %23, %cst_30 {dimension_numbers = #tpu.dot_dimension_numbers<[1], [0], [0], [1], [0, 0, 1, 1], [], []>} : vector<128x128xf32>, vector<128x16xf32>, vector<128x16xf32> -> vector<128x16xf32>
    %76 = vector.extract_strided_slice %75 {offsets = [0, 0], sizes = [64, 16], strides = [1, 1]} : vector<128x16xf32> to vector<64x16xf32>
    %77 = vector.extract_strided_slice %75 {offsets = [64, 0], sizes = [64, 16], strides = [1, 1]} : vector<128x16xf32> to vector<64x16xf32>
    %cst_31 = arith.constant dense<0.000000e+00> : vector<8x16xf32>
    %78 = tpu.matmul %11, %76, %cst_31 {dimension_numbers = #tpu.dot_dimension_numbers<[1], [0], [0], [1], [0, 0, 1, 1], [], []>} : vector<8x64xf32>, vector<64x16xf32>, vector<8x16xf32> -> vector<8x16xf32>
    %c0_32 = arith.constant 0 : index
    %c0_33 = arith.constant 0 : index
    %c0_34 = arith.constant 0 : index
    %79 = vector.load %arg3[%c0_32, %c0_33, %c0_34] : memref<2x8x16xf32, #tpu.memory_space<vmem>>, vector<1x8x16xf32>
    %80 = vector.shape_cast %79 : vector<1x8x16xf32> to vector<8x16xf32>
    %81 = vector.shape_cast %78 : vector<8x16xf32> to vector<1x8x16xf32>
    tpu.vector_store %arg3[%c0_32, %c0_33, %c0_34], %81 {strides = array<i32>} : memref<2x8x16xf32, #tpu.memory_space<vmem>>, vector<1x8x16xf32>,
    %cst_35 = arith.constant dense<0.000000e+00> : vector<8x128xf32>
    %82 = tpu.matmul %78, %47, %cst_35 {dimension_numbers = #tpu.dot_dimension_numbers<[1], [0], [0], [1], [0, 0, 1, 1], [], []>} : vector<8x16xf32>, vector<16x128xf32>, vector<8x128xf32> -> vector<8x128xf32>
    %cst_36 = arith.constant dense<0.000000e+00> : vector<64x128xf32>
    %83 = tpu.matmul %35, %82, %cst_36 {dimension_numbers = #tpu.dot_dimension_numbers<[1], [0], [0], [1], [0, 0, 1, 1], [], []>} : vector<64x8xf32>, vector<8x128xf32>, vector<64x128xf32> -> vector<64x128xf32>
    %c0_37 = arith.constant 0 : index
    %c0_38 = arith.constant 0 : index
    %c0_39 = arith.constant 0 : index
    %c0_40 = arith.constant 0 : index
    %84 = vector.load %arg2[%c0_37, %c0_38, %c0_39, %c0_40] : memref<2x3x64x128xf32, #tpu.memory_space<vmem>>, vector<1x1x64x128xf32>
    %85 = vector.shape_cast %84 : vector<1x1x64x128xf32> to vector<64x128xf32>
    %86 = vector.shape_cast %83 : vector<64x128xf32> to vector<1x1x64x128xf32>
    tpu.vector_store %arg2[%c0_37, %c0_38, %c0_39, %c0_40], %86 {strides = array<i32>} : memref<2x3x64x128xf32, #tpu.memory_space<vmem>>, vector<1x1x64x128xf32>,
    %c0_41 = arith.constant 0 : index
    %c1_42 = arith.constant 1 : index
    %c0_43 = arith.constant 0 : index
    %c0_44 = arith.constant 0 : index
    %87 = vector.load %arg2[%c0_41, %c1_42, %c0_43, %c0_44] : memref<2x3x64x128xf32, #tpu.memory_space<vmem>>, vector<1x1x64x128xf32>
    %88 = vector.shape_cast %87 : vector<1x1x64x128xf32> to vector<64x128xf32>
    %89 = vector.shape_cast %83 : vector<64x128xf32> to vector<1x1x64x128xf32>
    tpu.vector_store %arg2[%c0_41, %c1_42, %c0_43, %c0_44], %89 {strides = array<i32>} : memref<2x3x64x128xf32, #tpu.memory_space<vmem>>, vector<1x1x64x128xf32>,
    %c0_45 = arith.constant 0 : index
    %c2_46 = arith.constant 2 : index
    %c0_47 = arith.constant 0 : index
    %c0_48 = arith.constant 0 : index
    %90 = vector.load %arg2[%c0_45, %c2_46, %c0_47, %c0_48] : memref<2x3x64x128xf32, #tpu.memory_space<vmem>>, vector<1x1x64x128xf32>
    %91 = vector.shape_cast %90 : vector<1x1x64x128xf32> to vector<64x128xf32>
    %92 = vector.shape_cast %83 : vector<64x128xf32> to vector<1x1x64x128xf32>
    tpu.vector_store %arg2[%c0_45, %c2_46, %c0_47, %c0_48], %92 {strides = array<i32>} : memref<2x3x64x128xf32, #tpu.memory_space<vmem>>, vector<1x1x64x128xf32>,
    %cst_49 = arith.constant dense<0.000000e+00> : vector<8x16xf32>
    %93 = tpu.matmul %11, %77, %cst_49 {dimension_numbers = #tpu.dot_dimension_numbers<[1], [0], [0], [1], [0, 0, 1, 1], [], []>} : vector<8x64xf32>, vector<64x16xf32>, vector<8x16xf32> -> vector<8x16xf32>
    %c1_50 = arith.constant 1 : index
    %c0_51 = arith.constant 0 : index
    %c0_52 = arith.constant 0 : index
    %94 = vector.load %arg3[%c1_50, %c0_51, %c0_52] : memref<2x8x16xf32, #tpu.memory_space<vmem>>, vector<1x8x16xf32>
    %95 = vector.shape_cast %94 : vector<1x8x16xf32> to vector<8x16xf32>
    %96 = vector.shape_cast %93 : vector<8x16xf32> to vector<1x8x16xf32>
    tpu.vector_store %arg3[%c1_50, %c0_51, %c0_52], %96 {strides = array<i32>} : memref<2x8x16xf32, #tpu.memory_space<vmem>>, vector<1x8x16xf32>,
    %cst_53 = arith.constant dense<0.000000e+00> : vector<8x128xf32>
    %97 = tpu.matmul %93, %47, %cst_53 {dimension_numbers = #tpu.dot_dimension_numbers<[1], [0], [0], [1], [0, 0, 1, 1], [], []>} : vector<8x16xf32>, vector<16x128xf32>, vector<8x128xf32> -> vector<8x128xf32>
    %cst_54 = arith.constant dense<0.000000e+00> : vector<64x128xf32>
    %98 = tpu.matmul %35, %97, %cst_54 {dimension_numbers = #tpu.dot_dimension_numbers<[1], [0], [0], [1], [0, 0, 1, 1], [], []>} : vector<64x8xf32>, vector<8x128xf32>, vector<64x128xf32> -> vector<64x128xf32>
    %c1_55 = arith.constant 1 : index
    %c0_56 = arith.constant 0 : index
    %c0_57 = arith.constant 0 : index
    %c0_58 = arith.constant 0 : index
    %99 = vector.load %arg2[%c1_55, %c0_56, %c0_57, %c0_58] : memref<2x3x64x128xf32, #tpu.memory_space<vmem>>, vector<1x1x64x128xf32>
    %100 = vector.shape_cast %99 : vector<1x1x64x128xf32> to vector<64x128xf32>
    %101 = vector.shape_cast %98 : vector<64x128xf32> to vector<1x1x64x128xf32>
    tpu.vector_store %arg2[%c1_55, %c0_56, %c0_57, %c0_58], %101 {strides = array<i32>} : memref<2x3x64x128xf32, #tpu.memory_space<vmem>>, vector<1x1x64x128xf32>,
    %c1_59 = arith.constant 1 : index
    %c1_60 = arith.constant 1 : index
    %c0_61 = arith.constant 0 : index
    %c0_62 = arith.constant 0 : index
    %102 = vector.load %arg2[%c1_59, %c1_60, %c0_61, %c0_62] : memref<2x3x64x128xf32, #tpu.memory_space<vmem>>, vector<1x1x64x128xf32>
    %103 = vector.shape_cast %102 : vector<1x1x64x128xf32> to vector<64x128xf32>
    %104 = vector.shape_cast %98 : vector<64x128xf32> to vector<1x1x64x128xf32>
    tpu.vector_store %arg2[%c1_59, %c1_60, %c0_61, %c0_62], %104 {strides = array<i32>} : memref<2x3x64x128xf32, #tpu.memory_space<vmem>>, vector<1x1x64x128xf32>,
    %c1_63 = arith.constant 1 : index
    %c2_64 = arith.constant 2 : index
    %c0_65 = arith.constant 0 : index
    %c0_66 = arith.constant 0 : index
    %105 = vector.load %arg2[%c1_63, %c2_64, %c0_65, %c0_66] : memref<2x3x64x128xf32, #tpu.memory_space<vmem>>, vector<1x1x64x128xf32>
    %106 = vector.shape_cast %105 : vector<1x1x64x128xf32> to vector<64x128xf32>
    %107 = vector.shape_cast %98 : vector<64x128xf32> to vector<1x1x64x128xf32>
    tpu.vector_store %arg2[%c1_63, %c2_64, %c0_65, %c0_66], %107 {strides = array<i32>} : memref<2x3x64x128xf32, #tpu.memory_space<vmem>>, vector<1x1x64x128xf32>,
    return
  }
  func.func @transform_0(%arg0: i32) -> (i32, i32, i32, i32) {
    %c0_i32 = arith.constant 0 : i32
    %c0_i32_0 = arith.constant 0 : i32
    %c0_i32_1 = arith.constant 0 : i32
    %c0_i32_2 = arith.constant 0 : i32
    return %arg0, %c0_i32, %c0_i32_0, %c0_i32_1 : i32, i32, i32, i32
  }
  func.func @transform_1(%arg0: i32) -> (i32, i32, i32, i32) {
    %c0_i32 = arith.constant 0 : i32
    %c0_i32_0 = arith.constant 0 : i32
    %c0_i32_1 = arith.constant 0 : i32
    %c0_i32_2 = arith.constant 0 : i32
    return %arg0, %c0_i32, %c0_i32_0, %c0_i32_1 : i32, i32, i32, i32
  }
  func.func @transform_2(%arg0: i32) -> (i32, i32, i32) {
    %c0_i32 = arith.constant 0 : i32
    %c0_i32_0 = arith.constant 0 : i32
    %c0_i32_1 = arith.constant 0 : i32
    return %arg0, %c0_i32, %c0_i32_0 : i32, i32, i32
  }
}

</mosaic_0001>

<bundles_post_ra>
// kernel: tpu_custom_call.1
= control target key start
LH: loop header
LB: loop body
LE: loop exit
PB: predicated region body
PF: predicated region fallthrough
CT: control target
= control target key end

     0   :  { %8 = vsyncpa [#allocation3], 0  ;;  %s2819_s0 = inlined_call_operand.hbm [shape: f32[4,3,64,128], index: 0, kind: input, shape index: {}]   ;;  %s2820_s1 = inlined_call_operand.hbm [shape: f32[4,3,64,128], index: 1, kind: output, shape index: {0}]   ;;  %s2821_s2 = inlined_call_operand.hbm [shape: f32[4,8,16], index: 2, kind: output, shape index: {1}]  }
   0x1   :  { %10 = vsyncpa [#allocation3 + $0x1], 0 }
   0x2   :  { %11 = vsyncpa [#allocation4], 0 }
   0x3   :  { %13 = vsyncpa [#allocation4 + $0x1], 0 }
   0x4   :  { %14 = vsyncpa [#allocation7], 0 }
   0x5   :  { %16 = vsyncpa [#allocation7 + $0x1], 0  ;;  %s2032_s9 = smov 0   ;;  %s2034_s10 = smov 0  }
   0x6   :  { %s2036_s11 = smov 0   ;;  %s2038_s12 = smov 0  }
   0x7 LB: > { %s2053_s13 = sadd.s32 4294967295, %s2003_s12   ;;  %s1409_s14 = sadd.s32 4294967294, %s2003_s12   ;;  %s2003_s12 = sphi %s2038_s12, %s2892_s12   ;;  %s1999_s11 = sphi %s2036_s11, %s2891_s11   ;;  %s1995_s10 = sphi %s2034_s10, %s2890_s10   ;;  %s1991_s9 = sphi %s2032_s9, %s2889_s9  }
   0x8   : > { %s2057_s15 = sadd.s32 1, %s2003_s12   ;;  %s29_s16 = sadd.s32 1, %s1999_s11 }
   0x9   : > { %s26_s17 = ssub.s32 %s2003_s12, %s2057_s15  ;;  %p36_p0 = scmp.ne.s32.totalorder %s1999_s11, %s1995_s10 }
   0xa   : > { %p27_p1 = scmp.eq.s32.totalorder %s26_s17, 0  ;;  %p37_p2 = scmp.eq.s32.totalorder %s2003_s12, 0 }
   0xb   : > { %p42_p3 = scmp.ne.s32.totalorder %s1995_s10, %s1991_s9  ;;  %p43_p4 = scmp.eq.s32.totalorder %s2053_s13, 0 }
   0xc   : > { %s2069_s18 = scalar_select %p27_p1, %s1999_s11, %s29_s16  }
   0xd   : > { %p38_p5 = por %p37_p2, %p36_p0  ;;  %p2071_p6 = por %p43_p4, %p42_p3 }
   0xe   : > { %p66_p7 = scmp.eq.s32.totalorder %s2053_s13, 1  ;;  %p72_p8 = scmp.eq.s32.totalorder %s1409_s14, 1 }
   0xf   : > { %p1832_p10 = scmp.lt.s32.totalorder %s2003_s12, 2  ;;  %s118_s22 = sand.u32 1, %s1999_s11  }
  0x10   : > { %p2078_p11 = por %p66_p7, %p36_p0  ;;  %p2082_p12 = por %p72_p8, %p42_p3 }
  0x11   : > { %s1812_s23 = smul.u32 6144, %s2003_s12  ;;  %p2093_p13 = pnand %p1832_p10, %p38_p5 }
  0x12   : > { %s2828_s20 = scalar_select %p2078_p11, 1, 0 }
  0x13   : > { %s2829_s21 = scalar_select %p2082_p12, 1, 0 }
  0x14   : > { %s1811_s24 = smul.u32 384, %s118_s22  ;;  %s2091_s27 = scalar_lea.hbm %s2819_s0, %s1812_s23 }
  0x15   : > { %s2099_s3 = scalar_lea.sflag [#allocation3], %s118_s22  ;;  %s1875_s4 = scalar_lea.hbm %s2091_s27, 6144 }
  0x16   : > { %s122_s29 = scalar_lea.vmem [#allocation2], %s1811_s24  ;;  %p1876_p0 = scmp.ne.s32.totalorder %s2091_s27, %s1875_s4 }
  0x17   : > { %s130_s30 = sshll.u32 %s122_s29, 4  ;;  %p1877_p1 = pneg %p2093_p13  ;;  %s2097_s30 = int_to_ptr.vmem [resolvable:$true] %s130_s30 }
  0x18   : > { %s1880_s7 = scalar_lea.hbm %s2819_s0, 12288  ;;  %p1881_p4 = scmp.lt.u32.totalorder %s2091_s27, %s2819_s0 }
  0x19   : > { %p1878_p2 = pnand %p1877_p1, %p1876_p0  ;;  %p1882_p5 = scmp.lt.u32.totalorder %s1880_s7, %s1875_s4 }
  0x1a   : > { %p1884_p8 = scmp.lt.u32.totalorder %s1875_s4, %s2091_s27 }
  0x1b   : > { %p1879_p3 = pneg %p1878_p2  ;;  %p1883_p7 = por %p1882_p5, %p1881_p4 }
  0x1d   : > { %p1885_p10 = por %p1884_p8, %p1883_p7 }
  0x1f   : > { %p1886_p9 = pnand %p1885_p10, %p1879_p3 }
  0x21   : > { %1889 = shalt.err (!%p1886_p9)
}
  0x22   : > { %s1890_s16 = scalar_lea.vmem %s2097_s30, 6144  ;;  %s2005_s17 = smov [#allocation2]  }
  0x23   : > { %p1891_p0 = scmp.ne.s32.totalorder %s2097_s30, %s1890_s16  ;;  %s1895_s22 = sshll.u32 %s2005_s17, 4  ;;  %s1896_s22 = int_to_ptr.vmem [resolvable:$false] %s1895_s22 }
  0x24   : > { %s1897_s23 = scalar_lea.vmem %s1896_s22, 12288  ;;  %p1898_p11 = scmp.lt.s32.totalorder %s2097_s30, %s1896_s22 }
  0x25   : > { %p1893_p2 = pnand %p1891_p0, %p1877_p1  ;;  %p1899_p4 = scmp.lt.s32.totalorder %s1897_s23, %s1890_s16 }
  0x27   : > { %p1894_p12 = pneg %p1893_p2  ;;  %p1900_p5 = por %p1899_p4, %p1898_p11 }
  0x29   : > { %p1901_p7 = pnand %p1900_p5, %p1894_p12 }
  0x2b   : > { %1904 = shalt.err (!%p1901_p7)
}
  0x2c   : > { %s2006_s24 = smov 128   ;;  %s2007_s25 = smov 8  }
  0x2d   : > { %1824 = dma.hbm_to_vmem [thread:$0]  (!%p2093_p13), %s2091_s27, 6144, %s2097_s30, %s2099_s3, %s2006_s24, %s2006_s24, %s2007_s25  }
  0x2e   : > { %p1415_p9 = scmp.ge.s32.totalorder %s2003_s12, 1  ;;  %p138_p1 = scmp.lt.s32.totalorder %s2003_s12, 3 }
  0x30   : > { %p139_p3 = pnand %p1415_p9, %p138_p1 }
  0x31   : > { %s2130_s26 = sand.u32 (!%p139_p3), 1, %s1995_s10   ;;  %v177_v0 = vlaneseq (!%p139_p3) }
  0x32   : > { %142 = sbr.rel (%p139_p3) target bundleno = 1439 (0x59f), region = 24  ;;  %s145_s4 = scalar_lea.sflag (!%p139_p3), [#allocation3], %s2130_s26 }
  0x33   : > { %s1813_s29 = smul.u32 (!%p139_p3), 384, %s2130_s26 }
  0x35   : > { %s2136_s5 = scalar_lea.vmem (!%p139_p3), [#allocation2], %s1813_s29 }
  0x39   : > { %1978 = dma.done.wait (%p2071_p6), %s145_s4, 6144  }
  0x3a   : > { %1980 = vsyncadd (%p2071_p6), %s145_s4, 4294961152  ;;  %v2142_v1 = vshrl.u32 %v177_v0, 7  ;;  %v2144_v2 = vand.u32 127, %v177_v0  ;;  %v283_v18 = vld [vmem:[%s2136_s5] sm:$0xff]  ;;  %v2008_v19 = vmov 0.125|0.125  }
  0x3b   : > { %v1417_v22 = vld [vmem:[%s2136_s5 + $0x40] sm:$0xff]  ;;  %v284_v26 = vld [vmem:[%s2136_s5 + $0x8] sm:$0xff]  ;;  %v299_v28 = vmul.f32 255.0, %v283_v18  ;;  %v2841_v33 = vmov 0  ;;  %v285_v35 = vld [vmem:[%s2136_s5 + $0x10] sm:$0xff]  ;;  %v2843_v40 = vmov 0 }
  0x3c   : > { %v2147_v3 = vadd.s32 8, %v2142_v1  ;;  %v2150_v4 = vmul.u32 8, %v2144_v2  ;;  %v188_v5 = vadd.s32 16, %v2142_v1  ;;  %v189_v6 = vadd.s32 24, %v2142_v1  ;;  %v1433_v23 = vld [vmem:[%s2136_s5 + $0x80] sm:$0xff]  ;;  %v1418_v31 = vld [vmem:[%s2136_s5 + $0x48] sm:$0xff] }
  0x3d   : > { %v190_v7 = vadd.s32 32, %v2142_v1  ;;  %v191_v9 = vadd.s32 40, %v2142_v1  ;;  %v2164_v10 = vadd.s32 48, %v2142_v1  ;;  %v2171_v11 = vadd.s32 56, %v2142_v1  ;;  %v1434_v32 = vld [vmem:[%s2136_s5 + $0x88] sm:$0xff]  ;;  %v1419_v36 = vld [vmem:[%s2136_s5 + $0x50] sm:$0xff] }
  0x3e   : > { %vm203_vm0 = vcmp.ge.s32.totalorder %v2142_v1, %v2150_v4  ;;  %v2158_v8 = vadd.s32 8, %v2150_v4  ;;  %vm204_vm1 = vcmp.ge.s32.totalorder %v2147_v3, %v2150_v4  ;;  %vm205_vm5 = vcmp.ge.s32.totalorder %v188_v5, %v2150_v4  ;;  %v1435_v45 = vld [vmem:[%s2136_s5 + $0x90] sm:$0xff]  ;;  %v286_v55 = vld [vmem:[%s2136_s5 + $0x18] sm:$0xff]  ;;  %s1416_s19 = sshll.u32 %s2130_s26, 4  ;;  %s2663_s28 = scalar_lea.vmem [#allocation5], %s1813_s29 }
  0x3f   : > { %vm206_vm6 = vcmp.ge.s32.totalorder %v189_v6, %v2150_v4  ;;  %vm207_vm8 = vcmp.ge.s32.totalorder %v190_v7, %v2150_v4  ;;  %vm208_vm11 = vcmp.ge.s32.totalorder %v191_v9, %v2150_v4  ;;  %v2188_v14 = vadd.s32 64, %v2142_v1  ;;  %v1420_v61 = vld [vmem:[%s2136_s5 + $0x58] sm:$0xff]  ;;  %s2592_s27 = scalar_lea.vmem [#allocation6], %s1416_s19  ;;  %s1538_s3 = sshll.u32 %s2053_s13, 8 }
  0x40   : > { %vm220_vm2 = vcmp.lt.s32.totalorder %v2142_v1, %v2158_v8  ;;  %vm221_vm3 = vcmp.lt.s32.totalorder %v2147_v3, %v2158_v8  ;;  %vm222_vm7 = vcmp.lt.s32.totalorder %v188_v5, %v2158_v8  ;;  %vm223_vm10 = vcmp.lt.s32.totalorder %v189_v6, %v2158_v8  ;;  %v1436_v62 = vld [vmem:[%s2136_s5 + $0x98] sm:$0xff]  ;;  %v287_v6 = vld [vmem:[%s2136_s5 + $0x20] sm:$0xff]  ;;  %s1304_s30 = sshll.u32 %s2592_s27, 4  ;;  %s2712_s8 = scalar_lea.hbm %s2821_s2, %s1538_s3  ;;  %s2707_s30 = int_to_ptr.vmem [resolvable:$true] %s1304_s30 }
  0x41   : > { %vm2173_vm4 = vmand %vm203_vm0, %vm220_vm2  ;;  %v2191_v15 = vadd.s32 72, %v2142_v1  ;;  %vm224_vm13 = vcmp.lt.s32.totalorder %v190_v7, %v2158_v8  ;;  %vm209_vm14 = vcmp.ge.s32.totalorder %v2164_v10, %v2150_v4  ;;  %v2201_v16 = vadd.s32 80, %v2142_v1  ;;  %s1274_s14 = scalar_lea.sflag [#allocation7], %s2130_s26  ;;  %s1905_s16 = scalar_lea.vmem %s2707_s30, 256 }
  0x42   : > { %vm2181_vm9 = vmand %vm204_vm1, %vm221_vm3  ;;  %v2204_v17 = vadd.s32 88, %v2142_v1  ;;  %vm225_vm0 = vcmp.lt.s32.totalorder %v191_v9, %v2158_v8  ;;  %vm226_vm2 = vcmp.lt.s32.totalorder %v2164_v10, %v2158_v8  ;;  %v2222_v21 = vadd.s32 96, %v2142_v1  ;;  %p1906_p6 = scmp.ne.s32.totalorder %s2707_s30, %s1905_s16  ;;  %p2886_p11 = scmp.ne.s32.totalorder %s2828_s20, 0 }
  0x43   : > { %vm1749_vm12 = vmpackc.low %vm2181_vm9, %vm2173_vm4  ;;  %v2254_v25 = vadd.s32 104, %v2142_v1  ;;  %v348_v29 = vmul.f32 255.0, %v1417_v22  ;;  %v397_v30 = vmul.f32 255.0, %v1433_v23  ;;  %v2290_v34 = vadd.s32 112, %v2142_v1  ;;  %s2013_s17 = smov [#allocation6]  }
  0x44   : > { %1750 = vmatprep.subr.msk.bf16.mxu0 %vm1749_vm12, %v2008_v19  ;;  %vm2212_vm15 = vmand %vm205_vm5, %vm222_vm7  ;;  %v2307_v37 = vadd.s32 120, %v2142_v1  ;;  %v315_v38 = vfloor.f32 %v299_v28  ;;  %v300_v42 = vmul.f32 255.0, %v284_v26  ;;  %v349_v43 = vmul.f32 255.0, %v1418_v31  ;;  %v1421_v26 = vld [vmem:[%s2136_s5 + $0x60] sm:$0xff]  ;;  %p1907_p12 = pnand %p1906_p6, %p2886_p11  ;;  %s1909_s22 = sshll.u32 %s2013_s17, 4  ;;  %s1910_s22 = int_to_ptr.vmem [resolvable:$false] %s1909_s22 }
  0x45   : > { %1752 = vmatpush3.bf16.msk.msra.mxu0 %vm1749_vm12, %v2008_v19  ;;  %vm2231_vm3 = vmand %vm206_vm6, %vm223_vm10  ;;  %vm228_vm12 = vcmp.lt.s32.totalorder %v2188_v14, %v2158_v8  ;;  %vm229_vm10 = vcmp.lt.s32.totalorder %v2191_v15, %v2158_v8  ;;  %v364_v39 = vfloor.f32 %v348_v29  ;;  %v413_v41 = vfloor.f32 %v397_v30  ;;  %s1911_s23 = scalar_lea.vmem %s1910_s22, 512  ;;  %p1912_p8 = scmp.lt.s32.totalorder %s2707_s30, %s1910_s22 }
  0x46   : > { %vm1753_vm6 = vmpackc.low %vm2231_vm3, %vm2212_vm15  ;;  %v398_v44 = vmul.f32 255.0, %v1434_v32  ;;  %v2847_v46 = vmov 0  ;;  %v429_v47 = vmul.f32 19595.0, %v315_v38  ;;  %v301_v49 = vmul.f32 255.0, %v285_v35  ;;  %v1437_v32 = vld [vmem:[%s2136_s5 + $0xa0] sm:$0xff]  ;;  %p1908_p13 = pneg %p1907_p12  ;;  %p1913_p10 = scmp.lt.s32.totalorder %s1911_s23, %s1905_s16 }
  0x47   : > { %1754 = vmatprep.subr.msk.bf16.mxu0 %vm1753_vm6, %v2008_v19  ;;  %vm2267_vm5 = vmand %vm207_vm8, %vm224_vm13  ;;  %vm2846_vm13 = vcmp.ge.s32.totalorder %v2171_v11, %v2150_v4  ;;  %v445_v48 = vmul.f32 38470.0, %v364_v39  ;;  %v350_v50 = vmul.f32 255.0, %v1419_v36  ;;  %v477_v51 = vmul.f32 7471.0, %v413_v41 }
  0x48   : > { %vm2279_vm1 = vmand %vm208_vm11, %vm225_vm0  ;;  %vm2845_vm0 = vcmp.lt.s32.totalorder %v2171_v11, %v2158_v8  ;;  %v316_v52 = vfloor.f32 %v300_v42  ;;  %v365_v53 = vfloor.f32 %v349_v43  ;;  %v414_v54 = vfloor.f32 %v398_v44  ;;  %v288_v44 = vld [vmem:[%s2136_s5 + $0x28] sm:$0xff]  ;;  %p1914_p0 = por %p1913_p10, %p1912_p8 }
  0x49   : > { %v2842_v33 = vsel %vm2279_vm1, 4294967295, %v2841_v33  ;;  %1756 = vmatpush3.bf16.msk.msra.mxu0 %vm1753_vm6, %v2008_v19  ;;  %vm1757_vm11 = vmpackc.low %vm2279_vm1, %vm2267_vm5  ;;  %v461_v57 = vadd.f32 %v445_v48, %v429_v47  ;;  %v317_v58 = vfloor.f32 %v301_v49  ;;  %v366_v59 = vfloor.f32 %v350_v50  ;;  %v1438_v50 = vld [vmem:[%s2136_s5 + $0xa8] sm:$0xff] }
  0x4a   : > { %1758 = vmatprep.subr.msk.bf16.mxu0 %vm1757_vm11, %v2008_v19  ;;  %vm2321_vm6 = vmand %vm209_vm14, %vm226_vm2  ;;  %vm2849_vm2 = vcmp.ge.s32.totalorder %v2188_v14, %v2150_v4  ;;  %v399_v60 = vmul.f32 255.0, %v1435_v45  ;;  %v430_v0 = vmul.f32 19595.0, %v316_v52  ;;  %v446_v5 = vmul.f32 38470.0, %v365_v53  ;;  %v1422_v45 = vld [vmem:[%s2136_s5 + $0x68] sm:$0xff]  ;;  %p1915_p2 = pnand %p1914_p0, %p1908_p13 }
  0x4b   : > { %v2844_v40 = vsel %vm2321_vm6, 4294967295, %v2843_v40  ;;  %vm2332_vm7 = vmand %vm2846_vm13, %vm2845_vm0  ;;  %v493_v7 = vadd.f32 %v477_v51, %v461_v57  ;;  %v431_v10 = vmul.f32 19595.0, %v317_v58  ;;  %v447_v11 = vmul.f32 38470.0, %v366_v59  ;;  %v289_v53 = vld [vmem:[%s2136_s5 + $0x30] sm:$0xff] }
  0x4c   : > { %v2848_v46 = vsel %vm2332_vm7, 4294967295, %v2847_v46  ;;  %vm1761_vm14 = vmpackc.low %vm2332_vm7, %vm2321_vm6  ;;  %v415_v9 = vfloor.f32 %v399_v60  ;;  %v302_v18 = vmul.f32 255.0, %v286_v55  ;;  %v351_v22 = vmul.f32 255.0, %v1420_v61  ;;  %v1423_v58 = vld [vmem:[%s2136_s5 + $0x70] sm:$0xff]  ;;  %v1424_v14 = vld [vmem:[%s2136_s5 + $0x78] sm:$0xff] }
  0x4d   : > { %1760 = vmatpush3.bf16.msk.msra.mxu0 %vm1757_vm11, %v2008_v19  ;;  %vm2353_vm13 = vmand %vm2849_vm2, %vm228_vm12  ;;  %vm2852_vm12 = vcmp.ge.s32.totalorder %v2191_v15, %v2150_v4  ;;  %v478_v15 = vmul.f32 7471.0, %v414_v54  ;;  %v400_v23 = vmul.f32 255.0, %v1436_v62  ;;  %vm2859_vm0 = vcmp.lt.s32.totalorder %v2204_v17, %v2158_v8 }
  0x4e   : > { %1762 = vmatprep.subr.msk.bf16.mxu0 %vm1761_vm14, %v2008_v19  ;;  %vm2371_vm11 = vmand %vm2852_vm12, %vm229_vm10  ;;  %vm2855_vm10 = vcmp.lt.s32.totalorder %v2201_v16, %v2158_v8  ;;  %vm2856_vm12 = vcmp.ge.s32.totalorder %v2201_v16, %v2150_v4  ;;  %v509_v28 = vmul.f32 1.5258789e-05, %v493_v7  ;;  %v462_v29 = vadd.f32 %v446_v5, %v430_v0  ;;  %v1439_v0 = vld [vmem:[%s2136_s5 + $0xb0] sm:$0xff] }
  0x4f   : > { %vm2824_vm8 = vmpackc.low %vm2371_vm11, %vm2353_vm13  ;;  %v463_v30 = vadd.f32 %v447_v11, %v431_v10  ;;  %v303_v31 = vmul.f32 255.0, %v287_v6  ;;  %v318_v35 = vfloor.f32 %v302_v18  ;;  %v367_v36 = vfloor.f32 %v351_v22 }
  0x50   : > { %vm2390_vm2 = vmand %vm2856_vm12, %vm2855_vm10  ;;  %vm2860_vm10 = vcmp.ge.s32.totalorder %v2204_v17, %v2150_v4  ;;  %v479_v17 = vmul.f32 7471.0, %v415_v9  ;;  %v416_v38 = vfloor.f32 %v400_v23  ;;  %v525_v41 = vfloor.f32 %v509_v28 }
  0x51   : > { %1764 = vmatpush3.bf16.msk.msra.mxu0 %vm1761_vm14, %v2008_v19  ;;  %vm2407_vm12 = vmand %vm2860_vm10, %vm2859_vm0  ;;  %vm2863_vm0 = vcmp.lt.s32.totalorder %v2222_v21, %v2158_v8  ;;  %vm2864_vm10 = vcmp.ge.s32.totalorder %v2222_v21, %v2150_v4  ;;  %v319_v42 = vfloor.f32 %v303_v31  ;;  %v352_v43 = vmul.f32 255.0, %v1421_v26 }
  0x52   : > { %1766 = vmatprep.subr.msk.bf16.mxu0 %vm2824_vm8, %v2008_v19  ;;  %vm2428_vm7 = vmand %vm2864_vm10, %vm2863_vm0  ;;  %vm234_vm8 = vcmp.lt.s32.totalorder %v2290_v34, %v2158_v8  ;;  %vm2867_vm14 = vcmp.lt.s32.totalorder %v2254_v25, %v2158_v8  ;;  %vm2868_vm6 = vcmp.ge.s32.totalorder %v2254_v25, %v2150_v4  ;;  %vm218_vm0 = vcmp.ge.s32.totalorder %v2307_v37, %v2150_v4 }
  0x53   : > { %vm2442_vm1 = vmand %vm2868_vm6, %vm2867_vm14  ;;  %v432_v47 = vmul.f32 19595.0, %v318_v35  ;;  %v448_v48 = vmul.f32 38470.0, %v367_v36  ;;  %v401_v49 = vmul.f32 255.0, %v1437_v32  ;;  %vm235_vm6 = vcmp.lt.s32.totalorder %v2307_v37, %v2158_v8  ;;  %1645 = vmatprep.mubr.f32.mxu0 %v525_v41  ;;  %v290_v37 = vld [vmem:[%s2136_s5 + $0x38] sm:$0xff] }
  0x54   : > { %vm2871_vm10 = vmpackc.low %vm2371_vm11, %vm2353_vm13  ;;  %v494_v25 = vadd.f32 %v478_v15, %v462_v29  ;;  %v368_v51 = vfloor.f32 %v352_v43  ;;  %v433_v52 = vmul.f32 19595.0, %v319_v42  ;;  %v495_v54 = vadd.f32 %v479_v17, %v463_v30  ;;  %v1440_v29 = vld [vmem:[%s2136_s5 + $0xb8] sm:$0xff] }
  0x55   : > { %1768 = vmatpush3.bf16.msk.msra.mxu0 %vm2871_vm10, %v2008_v19  ;;  %vm2872_vm14 = vmpackc.low %vm2407_vm12, %vm2390_vm2  ;;  %v480_v55 = vmul.f32 7471.0, %v416_v38  ;;  %v417_v56 = vfloor.f32 %v401_v49  ;;  %v304_v57 = vmul.f32 255.0, %v288_v44  ;;  %vm2873_vm11 = vcmp.ge.s32.totalorder %v2290_v34, %v2150_v4 }
  0x56   : > { %1770 = vmatprep.subr.msk.bf16.mxu0 %vm2872_vm14, %v2008_v19  ;;  %vm1773_vm13 = vmpackc.low %vm2442_vm1, %vm2428_vm7  ;;  %v464_v60 = vadd.f32 %v448_v48, %v432_v47  ;;  %v449_v61 = vmul.f32 38470.0, %v368_v51  ;;  %v353_v62 = vmul.f32 255.0, %v1422_v45  ;;  %v402_v63 = vmul.f32 255.0, %v1438_v50 }
  0x57   : > { %vm2475_vm10 = vmand %vm2873_vm11, %vm234_vm8  ;;  %v481_v34 = vmul.f32 7471.0, %v417_v56  ;;  %v320_v6 = vfloor.f32 %v304_v57  ;;  %v305_v7 = vmul.f32 255.0, %v289_v53  ;;  %v354_v4 = vmul.f32 255.0, %v1423_v58 }
  0x58   : > { %vm2486_vm14 = vmand %vm218_vm0, %vm235_vm6  ;;  %v465_v9 = vadd.f32 %v449_v61, %v433_v52  ;;  %v369_v8 = vfloor.f32 %v353_v62  ;;  %v418_v10 = vfloor.f32 %v402_v63  ;;  %v510_v11 = vmul.f32 1.5258789e-05, %v494_v25 }
  0x59   : > { %vm2878_vm8 = vmpackc.low %vm2407_vm12, %vm2390_vm2  ;;  %v434_v15 = vmul.f32 19595.0, %v320_v6  ;;  %v321_v18 = vfloor.f32 %v305_v7  ;;  %v403_v22 = vmul.f32 255.0, %v1439_v0  ;;  %v511_v23 = vmul.f32 1.5258789e-05, %v495_v54  ;;  %v1425_v6 = vld [vmem:[%s2136_s5 + $0x100] sm:$0xff] }
  0x5a   : > { %1772 = vmatpush3.bf16.msk.msra.mxu0 %vm2878_vm8, %v2008_v19  ;;  %vm1777_vm2 = vmpackc.low %vm2486_vm14, %vm2475_vm10  ;;  %v496_v26 = vadd.f32 %v480_v55, %v464_v60  ;;  %v450_v16 = vmul.f32 38470.0, %v369_v8  ;;  %v370_v28 = vfloor.f32 %v354_v4  ;;  %v482_v30 = vmul.f32 7471.0, %v418_v10  ;;  %v1441_v7 = vld [vmem:[%s2136_s5 + $0x140] sm:$0xff]  ;;  %v292_v4 = vld [vmem:[%s2136_s5 + $0xc8] sm:$0xff] }
  0x5b   : > { %1774 = vmatprep.subr.msk.bf16.mxu0 %vm1773_vm13, %v2008_v19  ;;  %v419_v31 = vfloor.f32 %v403_v22  ;;  %v435_v32 = vmul.f32 19595.0, %v321_v18  ;;  %v306_v17 = vmul.f32 255.0, %v290_v37  ;;  %v497_v35 = vadd.f32 %v481_v34, %v465_v9  ;;  %v291_v34 = vld [vmem:[%s2136_s5 + $0xc0] sm:$0xff]  ;;  %v1426_v37 = vld [vmem:[%s2136_s5 + $0x108] sm:$0xff] }
  0x5c   : > { %v466_v36 = vadd.f32 %v450_v16, %v434_v15  ;;  %v451_v38 = vmul.f32 38470.0, %v370_v28  ;;  %v355_v41 = vmul.f32 255.0, %v1424_v14  ;;  %v404_v44 = vmul.f32 255.0, %v1440_v29  ;;  %v1442_v18 = vld [vmem:[%s2136_s5 + $0x148] sm:$0xff] }
  0x5d   : > { %v483_v42 = vmul.f32 7471.0, %v419_v31  ;;  %v322_v43 = vfloor.f32 %v306_v17  ;;  %v526_v45 = vfloor.f32 %v510_v11  ;;  %v512_v39 = vmul.f32 1.5258789e-05, %v496_v26 }
  0x5e   : > { %1776 = vmatpush3.bf16.msk.msra.mxu0 %vm1773_vm13, %v2008_v19  ;;  %v467_v21 = vadd.f32 %v451_v38, %v435_v32  ;;  %v371_v47 = vfloor.f32 %v355_v41  ;;  %v498_v48 = vadd.f32 %v482_v30, %v466_v36  ;;  %v420_v49 = vfloor.f32 %v404_v44 }
  0x5f   : > { %1778 = vmatprep.subr.msk.bf16.mxu0 %vm1777_vm2, %v2008_v19  ;;  %v436_v50 = vmul.f32 19595.0, %v322_v43  ;;  %v527_v25 = vfloor.f32 %v511_v23  ;;  %v513_v51 = vmul.f32 1.5258789e-05, %v497_v35  ;;  %v528_v56 = vfloor.f32 %v512_v39 }
  0x60   : > { %v499_v52 = vadd.f32 %v483_v42, %v467_v21  ;;  %v452_v53 = vmul.f32 38470.0, %v371_v47  ;;  %v484_v54 = vmul.f32 7471.0, %v420_v49  ;;  %v514_v57 = vmul.f32 1.5258789e-05, %v498_v48 }
  0x61   : > { %v529_v58 = vfloor.f32 %v513_v51  ;;  %v2009_v0 = vmov 0.0|0.0   ;;  %vm2010_vm1 = vmmov 0   ;;  %v2011_v5 = vmov 0.0  }
  0x62   : > { %1780 = vmatpush3.bf16.msk.msra.mxu0 %vm1777_vm2, %v2008_v19  ;;  %v468_v55 = vadd.f32 %v452_v53, %v436_v50  ;;  %v515_v60 = vmul.f32 1.5258789e-05, %v499_v52  ;;  %v530_v59 = vfloor.f32 %v514_v57  ;;  %1781 = vmatprep.subr.bf16.mxu1 %v2009_v0  ;;  %v307_v9 = vmul.f32 255.0, %v291_v34 }
  0x63   : > { %1685 = vmatprep.mubr.msk.f32.mxu1 %vm2010_vm1, %v2011_v5  ;;  %v356_v8 = vmul.f32 255.0, %v1425_v6  ;;  %v405_v10 = vmul.f32 255.0, %v1441_v7  ;;  %v308_v11 = vmul.f32 255.0, %v292_v4  ;;  %v357_v15 = vmul.f32 255.0, %v1426_v37  ;;  %v294_v7 = vld [vmem:[%s2136_s5 + $0xd8] sm:$0xff] }
  0x64   : > { %v500_v61 = vadd.f32 %v484_v54, %v468_v55  ;;  %v531_v19 = vfloor.f32 %v515_v60  ;;  %v323_v22 = vfloor.f32 %v307_v9  ;;  %v406_v26 = vmul.f32 255.0, %v1442_v18  ;;  %v1428_v9 = vld [vmem:[%s2136_s5 + $0x118] sm:$0xff] }
  0x65   : > { %1646 = vmatmul.mubr.f32.vlgmr.msra.gmra.mrb[0].mxu0 %v526_v45  ;;  %v372_v14 = vfloor.f32 %v356_v8  ;;  %v421_v23 = vfloor.f32 %v405_v10  ;;  %v324_v16 = vfloor.f32 %v308_v11  ;;  %v373_v28 = vfloor.f32 %v357_v15  ;;  %v1443_v8 = vld [vmem:[%s2136_s5 + $0x150] sm:$0xff]  ;;  %v1444_v18 = vld [vmem:[%s2136_s5 + $0x158] sm:$0xff] }
  0x66   : > { %1648 = vmatprep.mubr.f32.mxu0 %v527_v25  ;;  %v516_v62 = vmul.f32 1.5258789e-05, %v500_v61  ;;  %v437_v29 = vmul.f32 19595.0, %v323_v22  ;;  %v422_v32 = vfloor.f32 %v406_v26  ;;  %v181_v50 = vmul.u32 8, %v2142_v1  ;;  %v295_v26 = vld [vmem:[%s2136_s5 + $0xe0] sm:$0xff] }
  0x67   : > { %v453_v30 = vmul.f32 38470.0, %v372_v14  ;;  %v485_v31 = vmul.f32 7471.0, %v421_v23  ;;  %v438_v17 = vmul.f32 19595.0, %v324_v16 }
  0x68   : > { %v532_v63 = vfloor.f32 %v516_v62  ;;  %v454_v35 = vmul.f32 38470.0, %v373_v28  ;;  %v486_v38 = vmul.f32 7471.0, %v422_v32  ;;  %v276_v25 = vmul.u32 8, %v2147_v3  ;;  %v1429_v16 = vld [vmem:[%s2136_s5 + $0x120] sm:$0xff] }
  0x69   : > { %1649 = vmatmul.mubr.f32.gmra.mrb[2].mxu0 %v528_v56  ;;  %v469_v36 = vadd.f32 %v453_v30, %v437_v29  ;;  %v183_v54 = vadd.s32 8, %v181_v50  ;;  %vm182_vm7 = vcmp.ge.s32.totalorder %v2144_v2, %v181_v50  ;;  %vm686_vm10 = vcmask 523264   ;;  %v296_v32 = vld [vmem:[%s2136_s5 + $0xe8] sm:$0xff] }
  0x6a   : > { %1651 = vmatprep.mubr.f32.mxu0 %v529_v58  ;;  %v470_v41 = vadd.f32 %v454_v35, %v438_v17  ;;  %v278_v55 = vadd.s32 8, %v276_v25  ;;  %vm277_vm0 = vcmp.ge.s32.totalorder %v2144_v2, %v276_v25  ;;  %v2012_v62 = vmov 1.0|1.0   ;;  %v297_v25 = vld [vmem:[%s2136_s5 + $0xf0] sm:$0xff] }
  0x6b   : > { %v501_v42 = vadd.f32 %v485_v31, %v469_v36  ;;  %vm184_vm12 = vcmp.lt.s32.totalorder %v2144_v2, %v183_v54  ;;  %v310_v10 = vmul.f32 255.0, %v294_v7  ;;  %v359_v4 = vmul.f32 255.0, %v1428_v9  ;;  %v1447_v9 = vld [vmem:[%s2136_s5 + $0x170] sm:$0xff] }
  0x6c   : > { %v502_v43 = vadd.f32 %v486_v38, %v470_v41  ;;  %vm279_vm6 = vcmp.lt.s32.totalorder %v2144_v2, %v278_v55  ;;  %vm2545_vm13 = vmand %vm182_vm7, %vm184_vm12  ;;  %v407_v15 = vmul.f32 255.0, %v1443_v8  ;;  %v408_v23 = vmul.f32 255.0, %v1444_v18  ;;  %v1445_v41 = vld [vmem:[%s2136_s5 + $0x160] sm:$0xff]  ;;  %v298_v8 = vld [vmem:[%s2136_s5 + $0xf8] sm:$0xff] }
  0x6d   : > { %1652 = vmatmul.mubr.f32.gmra.mrb[4].mxu0 %v530_v59  ;;  %v517_v44 = vmul.f32 1.5258789e-05, %v501_v42  ;;  %vm2549_vm11 = vmand %vm277_vm0, %vm279_vm6  ;;  %v2556_v2 = vsel %vm2545_vm13, 0.0004901961, %v2011_v5  ;;  %v326_v22 = vfloor.f32 %v310_v10  ;;  %v375_v14 = vfloor.f32 %v359_v4  ;;  %v1448_v18 = vld [vmem:[%s2136_s5 + $0x178] sm:$0xff] }
  0x6e   : > { %1654 = vmatprep.mubr.f32.mxu0 %v531_v19  ;;  %v518_v45 = vmul.f32 1.5258789e-05, %v502_v43  ;;  %vm1794_vm14 = vmpackc.low %vm2549_vm11, %vm2545_vm13  ;;  %v293_v19 = vld [vmem:[%s2136_s5 + $0xd0] sm:$0xff]  ;;  %v423_v28 = vfloor.f32 %v407_v15  ;;  %v311_v31 = vmul.f32 255.0, %v295_v26  ;;  %v424_v17 = vfloor.f32 %v408_v23  ;;  %v1432_v15 = vld [vmem:[%s2136_s5 + $0x138] sm:$0xff] }
  0x6f   : > { %v533_v21 = vfloor.f32 %v517_v44  ;;  %v309_v34 = vmul.f32 255.0, %v293_v19  ;;  %v440_v35 = vmul.f32 19595.0, %v326_v22  ;;  %v456_v36 = vmul.f32 38470.0, %v375_v14 }
  0x70   : > { %v534_v47 = vfloor.f32 %v518_v45  ;;  %v360_v38 = vmul.f32 255.0, %v1429_v16  ;;  %v487_v43 = vmul.f32 7471.0, %v423_v28  ;;  %v327_v44 = vfloor.f32 %v311_v31 }
  0x71   : > { %1655 = vmatmul.mubr.f32.gmra.mrb[6].mxu0 %v532_v63  ;;  %v1427_v63 = vld [vmem:[%s2136_s5 + $0x110] sm:$0xff]  ;;  %v325_v37 = vfloor.f32 %v309_v34  ;;  %v409_v45 = vmul.f32 255.0, %v1445_v41  ;;  %v312_v50 = vmul.f32 255.0, %v296_v32  ;;  %v313_v19 = vmul.f32 255.0, %v297_v25 }
  0x72   : > { %1657 = vmatprep.mubr.f32.mxu0 %v533_v21  ;;  %v358_v6 = vmul.f32 255.0, %v1427_v63  ;;  %v1430_v21 = vld [vmem:[%s2136_s5 + $0x128] sm:$0xff]  ;;  %v1431_v63 = vld [vmem:[%s2136_s5 + $0x130] sm:$0xff]  ;;  %v411_v28 = vmul.f32 255.0, %v1447_v9  ;;  %vm760_vm8 = vcmask 130048   ;;  %vm835_vm2 = vcmask 64512  }
  0x73   : > { %v439_v29 = vmul.f32 19595.0, %v325_v37  ;;  %v361_v54 = vmul.f32 255.0, %v1430_v21  ;;  %v362_v26 = vmul.f32 255.0, %v1431_v63  ;;  %v2600_v63 = vsel %vm2173_vm4, 1.0, %v2011_v5 }
  0x74   : > { %v374_v11 = vfloor.f32 %v358_v6  ;;  %v2622_v13 = vsel %vm2231_vm3, 1.0, %v2011_v5  ;;  %v2628_v20 = vsel %vm2267_vm5, 1.0, %v2011_v5  ;;  %vm2883_vm4 = vnez %v2842_v33 }
  0x75   : > { %1658 = vmatmul.mubr.f32.gmra.mrb[8].mxu0 %v534_v47  ;;  %v1446_v47 = vld [vmem:[%s2136_s5 + $0x168] sm:$0xff]  ;;  %v378_v32 = vfloor.f32 %v362_v26  ;;  %v273_v24 = vsel %vm2883_vm4, 1.0, %v2011_v5 }
  0x76   : > { %v455_v30 = vmul.f32 38470.0, %v374_v11  ;;  %v329_v11 = vfloor.f32 %v313_v19 }
  0x78   : > { %v471_v42 = vadd.f32 %v455_v30, %v439_v29  ;;  %v443_v29 = vmul.f32 19595.0, %v329_v11  ;;  %v314_v30 = vmul.f32 255.0, %v298_v8 }
  0x7a   : > { %v330_v41 = vfloor.f32 %v314_v30 }
 0x138   : > { %v1647_v39 = vpop.f32.mrb[0].mxu0 }
 0x139   : > { %v607_v48 = vpop.f32.mrb[1].mxu0 }
 0x13a   : > { %v1782_v49 = vpack.c.bf16 %v1647_v39, %v607_v48  ;;  %v472_v39 = vadd.f32 %v456_v36, %v440_v35  ;;  %v488_v48 = vmul.f32 7471.0, %v424_v17  ;;  %v363_v17 = vmul.f32 255.0, %v1432_v15 }
 0x13b   : > { %v412_v35 = vmul.f32 255.0, %v1448_v18  ;;  %v2607_v15 = vsel %vm2181_vm9, 1.0, %v2011_v5  ;;  %vm2884_vm9 = vnez %v2844_v40 }
 0x13c   : > { %v1650_v51 = vpop.f32.mrb[2].mxu0  ;;  %1783 = vmatpush3.bf16.msra.mxu1 %v1782_v49  ;;  %v376_v49 = vfloor.f32 %v360_v38  ;;  %v504_v55 = vadd.f32 %v488_v48, %v472_v39  ;;  %v427_v38 = vfloor.f32 %v411_v28  ;;  %v444_v39 = vmul.f32 19595.0, %v330_v41 }
 0x13d   : > { %v617_v52 = vpop.f32.mrb[3].mxu0  ;;  %1784 = vmatprep.subr.bf16.mxu1 %v2009_v0  ;;  %v274_v27 = vsel %vm2884_vm9, 1.0, %v2011_v5 }
 0x13e   : > { %v1785_v53 = vpack.c.bf16 %v1650_v51, %v617_v52  ;;  %v503_v51 = vadd.f32 %v487_v43, %v471_v42  ;;  %v425_v52 = vfloor.f32 %v409_v45  ;;  %v520_v34 = vmul.f32 1.5258789e-05, %v504_v55 }
 0x13f   : > { %v459_v43 = vmul.f32 38470.0, %v378_v32  ;;  %v428_v45 = vfloor.f32 %v412_v35 }
 0x140   : > { %v1653_v56 = vpop.f32.mrb[4].mxu0  ;;  %1786 = vmatpush3.bf16.msra.mxu1 %v1785_v53  ;;  %v441_v53 = vmul.f32 19595.0, %v327_v44  ;;  %v536_v22 = vfloor.f32 %v520_v34  ;;  %v379_v44 = vfloor.f32 %v363_v17 }
 0x141   : > { %v627_v57 = vpop.f32.mrb[5].mxu0  ;;  %1787 = vmatprep.subr.bf16.mxu1 %v2009_v0  ;;  %v475_v48 = vadd.f32 %v459_v43, %v443_v29 }
 0x142   : > { %v1788_v58 = vpack.c.bf16 %v1653_v56, %v627_v57  ;;  %v457_v56 = vmul.f32 38470.0, %v376_v49  ;;  %v328_v57 = vfloor.f32 %v312_v50  ;;  %v460_v49 = vmul.f32 38470.0, %v379_v44 }
 0x143   : > { %v492_v50 = vmul.f32 7471.0, %v428_v45 }
 0x144   : > { %v1656_v1 = vpop.f32.mrb[6].mxu0  ;;  %1789 = vmatpush3.bf16.msra.mxu1 %v1788_v58  ;;  %v410_v58 = vmul.f32 255.0, %v1446_v47  ;;  %v473_v6 = vadd.f32 %v457_v56, %v441_v53  ;;  %v442_v4 = vmul.f32 19595.0, %v328_v57  ;;  %v491_v47 = vmul.f32 7471.0, %v427_v38 }
 0x145   : > { %v637_v3 = vpop.f32.mrb[7].mxu0  ;;  %1790 = vmatprep.subr.bf16.mxu1 %v2009_v0 }
 0x146   : > { %v1791_v61 = vpack.c.bf16 %v1656_v1, %v637_v3  ;;  %v519_v1 = vmul.f32 1.5258789e-05, %v503_v51  ;;  %v489_v3 = vmul.f32 7471.0, %v425_v52  ;;  %v426_v7 = vfloor.f32 %v410_v58 }
 0x147   : > { %v507_v51 = vadd.f32 %v491_v47, %v475_v48  ;;  %v476_v52 = vadd.f32 %v460_v49, %v444_v39 }
 0x148   : > { %1792 = vmatpush3.bf16.msra.mxu1 %v1791_v61  ;;  %v377_v61 = vfloor.f32 %v361_v54  ;;  %v535_v10 = vfloor.f32 %v519_v1  ;;  %v505_v14 = vadd.f32 %v489_v3, %v473_v6  ;;  %v490_v23 = vmul.f32 7471.0, %v426_v7  ;;  %v1659_v58 = vpop.f32.mrb[8].mxu0 }
 0x149   : > { %1793 = vmatprep.subr.bf16.mxu1 %v2009_v0  ;;  %v523_v53 = vmul.f32 1.5258789e-05, %v507_v51  ;;  %v508_v54 = vadd.f32 %v492_v50, %v476_v52  ;;  %v647_v1 = vpop.f32.mrb[9].mxu0 }
 0x14a   : > { %v458_v37 = vmul.f32 38470.0, %v377_v61  ;;  %1660 = vmatprep.mubr.f32.mxu0 %v535_v10  ;;  %v521_v31 = vmul.f32 1.5258789e-05, %v505_v14  ;;  %v1797_v3 = vpack.c.bf16 %v1659_v58, %v647_v1 }
 0x14b   : > { %1686 = vmatmul.mubr.msk.f32.vlgmr.msra.gmra.mrb[0].mxu1 %vm686_vm10, %v2556_v2  ;;  %1661 = vmatmul.mubr.f32.gmra.mrb[10].mxu0 %v536_v22  ;;  %v539_v55 = vfloor.f32 %v523_v53  ;;  %v524_v56 = vmul.f32 1.5258789e-05, %v508_v54  ;;  %v2612_v22 = vsel %vm2212_vm15, 1.0, %v2011_v5  ;;  %vm2885_vm15 = vnez %v2848_v46 }
 0x14c   : > { %1795 = vmatpush3.bf16.msk.msra.mxu1 %vm1794_vm14, %v2012_v62  ;;  %1692 = vmatprep.mubr.msk.f32.mxu1 %vm2010_vm1, %v2011_v5  ;;  %v474_v16 = vadd.f32 %v458_v37, %v442_v4  ;;  %v537_v42 = vfloor.f32 %v521_v31  ;;  %v275_v14 = vsel %vm2885_vm15, 1.0, %v2011_v5 }
 0x14d   : > { %v540_v57 = vfloor.f32 %v524_v56 }
 0x14e   : > { %v506_v36 = vadd.f32 %v490_v23, %v474_v16  ;;  %1663 = vmatprep.mubr.f32.mxu0 %v537_v42 }
 0x150   : > { %v522_v21 = vmul.f32 1.5258789e-05, %v506_v36 }
 0x152   : > { %v538_v25 = vfloor.f32 %v522_v21 }
 0x154   : > { %1664 = vmatmul.mubr.f32.gmra.mrb[12].mxu0 %v538_v25 }
 0x155   : > { %1666 = vmatprep.mubr.f32.mxu0 %v539_v55 }
 0x158   : > { %1667 = vmatmul.mubr.f32.gmra.mrb[14].mxu0 %v540_v57 }
 0x21e   : > { %v756_v61 = vpop.f32.mrb[0].mxu1  ;;  %v1662_v34 = vpop.f32.mrb[10].mxu0 }
 0x21f   : > { %761 = vst.msk [vmem:[%s2592_s27] sm:$0xff] %vm760_vm8, %v756_v61  ;;  %v1687_v19 = vpop.f32.mrb[1].mxu1  ;;  %1693 = vmatmul.mubr.msk.f32.vlgmr.msra.gmra.mrb[2].mxu1 %vm760_vm8, %v756_v61  ;;  %v657_v6 = vpop.f32.mrb[11].mxu0 }
 0x220   : > { %1697 = vmatprep.mubr.msk.f32.mxu1 %vm835_vm2, %v2600_v63  ;;  %v1800_v7 = vpack.c.bf16 %v1662_v34, %v657_v6 }
 0x227   : > { %v1665_v9 = vpop.f32.mrb[12].mxu0 }
 0x228   : > { %v667_v8 = vpop.f32.mrb[13].mxu0 }
 0x229   : > { %v1803_v10 = vpack.c.bf16 %v1665_v9, %v667_v8 }
 0x22b   : > { %v1668_v4 = vpop.f32.mrb[14].mxu0 }
 0x22c   : > { %v677_v37 = vpop.f32.mrb[15].mxu0 }
 0x22d   : > { %v1806_v11 = vpack.c.bf16 %v1668_v4, %v677_v37 }
 0x2f2   : > { %v831_v12 = vpop.f32.mrb[2].mxu1 }
 0x2f3   : > { %v1694_v18 = vpop.f32.mrb[3].mxu1  ;;  %1695 = vmatprep.subr.mxu1 %v831_v12 }
 0x2f4   : > { %1696 = vmatpush3.msra.mxu1 %v831_v12 }
 0x2f5   : > { %1698 = vmatmul.mubr.msk.f32.vlgmr.msra.gmra.mrb[4].mxu1 %vm835_vm2, %v2607_v15  ;;  %1796 = vmatprep.subr.bf16.mxu1 %v2009_v0 }
 0x2f6   : > { %1798 = vmatpush3.bf16.msra.mxu1 %v1797_v3  ;;  %1700 = vmatprep.mubr.msk.f32.mxu1 %vm835_vm2, %v2612_v22 }
 0x2f7   : > { %1799 = vmatprep.subr.bf16.mxu1 %v2009_v0 }
 0x2f9   : > { %1701 = vmatmul.mubr.msk.f32.gmra.mrb[6].mxu1 %vm835_vm2, %v2622_v13 }
 0x2fa   : > { %1801 = vmatpush3.bf16.msra.mxu1 %v1800_v7  ;;  %1703 = vmatprep.mubr.msk.f32.mxu1 %vm835_vm2, %v2628_v20 }
 0x2fb   : > { %1802 = vmatprep.subr.bf16.mxu1 %v2009_v0 }
 0x2fd   : > { %1704 = vmatmul.mubr.msk.f32.gmra.mrb[8].mxu1 %vm835_vm2, %v273_v24 }
 0x2fe   : > { %1804 = vmatpush3.bf16.msra.mxu1 %v1803_v10  ;;  %1706 = vmatprep.mubr.msk.f32.mxu1 %vm835_vm2, %v274_v27 }
 0x2ff   : > { %1805 = vmatprep.subr.bf16.mxu1 %v2009_v0 }
 0x301   : > { %1707 = vmatmul.mubr.msk.f32.gmra.mrb[10].mxu1 %vm835_vm2, %v275_v14 }
 0x302   : > { %1807 = vmatpush3.bf16.msra.mxu1 %v1806_v11  ;;  %1725 = vmatprep.mubr.msk.f32.mxu1 %vm2010_vm1, %v2011_v5 }
 0x303   : > { %1808 = vmatprep.subr.bf16.mxu1 %v2009_v0 }
 0x305   : > { %1726 = vmatmul.mubr.msk.f32.vlgmr.msra.gmra.mrb[12].mxu1 %vm686_vm10, %v2556_v2 }
 0x306   : > { %1810 = vmatpush3.bf16.msk.msra.mxu1 %vm1794_vm14, %v2012_v62  ;;  %1732 = vmatprep.mubr.msk.f32.mxu1 %vm2010_vm1, %v2011_v5 }
 0x3c8   : > { %v1699_v33 = vpop.f32.mrb[4].mxu1 }
 0x3c9   : > { %966 = vst [vmem:[%s2663_s28 + $0x8] sm:$0xff] %v1699_v33  ;;  %1478 = vst [vmem:[%s2663_s28 + $0x48] sm:$0xff] %v1699_v33  ;;  %v926_v40 = vpop.f32.mrb[5].mxu1 }
 0x3ca   : > { %1486 = vst [vmem:[%s2663_s28 + $0x88] sm:$0xff] %v1699_v33  ;;  %965 = vst [vmem:[%s2663_s28] sm:$0xff] %v926_v40 }
 0x3cb   : > { %1477 = vst [vmem:[%s2663_s28 + $0x40] sm:$0xff] %v926_v40  ;;  %1485 = vst [vmem:[%s2663_s28 + $0x80] sm:$0xff] %v926_v40 }
 0x3cc   : > { %v1702_v46 = vpop.f32.mrb[6].mxu1 }
 0x3cd   : > { %968 = vst [vmem:[%s2663_s28 + $0x18] sm:$0xff] %v1702_v46  ;;  %1480 = vst [vmem:[%s2663_s28 + $0x58] sm:$0xff] %v1702_v46  ;;  %v936_v0 = vpop.f32.mrb[7].mxu1 }
 0x3ce   : > { %1488 = vst [vmem:[%s2663_s28 + $0x98] sm:$0xff] %v1702_v46  ;;  %967 = vst [vmem:[%s2663_s28 + $0x10] sm:$0xff] %v936_v0 }
 0x3cf   : > { %1479 = vst [vmem:[%s2663_s28 + $0x50] sm:$0xff] %v936_v0  ;;  %1487 = vst [vmem:[%s2663_s28 + $0x90] sm:$0xff] %v936_v0 }
 0x3d0   : > { %v1705_v5 = vpop.f32.mrb[8].mxu1 }
 0x3d1   : > { %970 = vst [vmem:[%s2663_s28 + $0x28] sm:$0xff] %v1705_v5  ;;  %1482 = vst [vmem:[%s2663_s28 + $0x68] sm:$0xff] %v1705_v5  ;;  %v946_v60 = vpop.f32.mrb[9].mxu1 }
 0x3d2   : > { %1490 = vst [vmem:[%s2663_s28 + $0xa8] sm:$0xff] %v1705_v5  ;;  %969 = vst [vmem:[%s2663_s28 + $0x20] sm:$0xff] %v946_v60 }
 0x3d3   : > { %1481 = vst [vmem:[%s2663_s28 + $0x60] sm:$0xff] %v946_v60  ;;  %1489 = vst [vmem:[%s2663_s28 + $0xa0] sm:$0xff] %v946_v60 }
 0x3d4   : > { %v1708_v59 = vpop.f32.mrb[10].mxu1 }
 0x3d5   : > { %972 = vst [vmem:[%s2663_s28 + $0x38] sm:$0xff] %v1708_v59  ;;  %1484 = vst [vmem:[%s2663_s28 + $0x78] sm:$0xff] %v1708_v59  ;;  %v956_v2 = vpop.f32.mrb[11].mxu1 }
 0x3d6   : > { %1492 = vst [vmem:[%s2663_s28 + $0xb8] sm:$0xff] %v1708_v59  ;;  %971 = vst [vmem:[%s2663_s28 + $0x30] sm:$0xff] %v956_v2 }
 0x3d7   : > { %1483 = vst [vmem:[%s2663_s28 + $0x70] sm:$0xff] %v956_v2  ;;  %1491 = vst [vmem:[%s2663_s28 + $0xb0] sm:$0xff] %v956_v2 }
 0x3d8   : > { %v1057_v62 = vpop.f32.mrb[12].mxu1 }
 0x3d9   : > { %1494 = vst.msk [vmem:[%s2592_s27 + $0x8] sm:$0xff] %vm760_vm8, %v1057_v62  ;;  %v1727_v23 = vpop.f32.mrb[13].mxu1  ;;  %1733 = vmatmul.mubr.msk.f32.vlgmr.msra.gmra.mrb[14].mxu1 %vm760_vm8, %v1057_v62 }
 0x3da   : > { %1737 = vmatprep.mubr.msk.f32.mxu1 %vm835_vm2, %v2600_v63 }
 0x4ac   : > { %v1132_v26 = vpop.f32.mrb[14].mxu1 }
 0x4ad   : > { %v1734_v16 = vpop.f32.mrb[15].mxu1  ;;  %1735 = vmatprep.subr.mxu1 %v1132_v26 }
 0x4ae   : > { %1736 = vmatpush3.msra.mxu1 %v1132_v26 }
 0x4af   : > { %1738 = vmatmul.mubr.msk.f32.vlgmr.msra.gmra.mrb[16].mxu1 %vm835_vm2, %v2607_v15 }
 0x4b0   : > { %1740 = vmatprep.mubr.msk.f32.mxu1 %vm835_vm2, %v2612_v22 }
 0x4b3   : > { %1741 = vmatmul.mubr.msk.f32.gmra.mrb[18].mxu1 %vm835_vm2, %v2622_v13 }
 0x4b4   : > { %1743 = vmatprep.mubr.msk.f32.mxu1 %vm835_vm2, %v2628_v20 }
 0x4b7   : > { %1744 = vmatmul.mubr.msk.f32.gmra.mrb[20].mxu1 %vm835_vm2, %v273_v24 }
 0x4b8   : > { %1746 = vmatprep.mubr.msk.f32.mxu1 %vm835_vm2, %v274_v27 }
 0x4bb   : > { %1747 = vmatmul.mubr.msk.f32.gmra.mrb[22].mxu1 %vm835_vm2, %v275_v14 }
 0x4bc   : > { %1918 = shalt.err (!%p1915_p2)
}
 0x4bd   : > { %s1919_s24 = scalar_lea.hbm %s2712_s8, 256  ;;  %s1923_s4 = scalar_lea.hbm %s2821_s2, 512 }
 0x4be   : > { %p1920_p4 = scmp.ne.s32.totalorder %s2712_s8, %s1919_s24  ;;  %p1924_p9 = scmp.lt.u32.totalorder %s2712_s8, %s2821_s2 }
 0x4bf   : > { %p1925_p1 = scmp.lt.u32.totalorder %s1923_s4, %s1919_s24  ;;  %p1927_p6 = scmp.lt.u32.totalorder %s1919_s24, %s2712_s8 }
 0x4c0   : > { %p1921_p5 = pnand %p1920_p4, %p2886_p11 }
 0x4c1   : > { %p1926_p3 = por %p1925_p1, %p1924_p9 }
 0x4c2   : > { %p1922_p7 = pneg %p1921_p5 }
 0x4c3   : > { %p1928_p12 = por %p1927_p6, %p1926_p3 }
 0x4c5   : > { %p1929_p13 = pnand %p1928_p12, %p1922_p7 }
 0x4c7   : > { %1932 = shalt.err (!%p1929_p13)
}
 0x4c8   : > { %s2014_s27 = smov 128   ;;  %s2015_s3 = smov 8  }
 0x4c9   : > { %1818 = dma.vmem_to_hbm [thread:$0]  (%p2886_p11), %s2707_s30, 256, %s2712_s8, %s1274_s14, %s2014_s27, %s2014_s27, %s2015_s3  }
 0x4ca   : > { %s1814_s30 = smul.u32 6144, %s2053_s13  ;;  %s1288_s6 = sshll.u32 %s2663_s28, 4  ;;  %s2766_s6 = int_to_ptr.vmem [resolvable:$true] %s1288_s6 }
 0x4cb   : > { %s1269_s13 = scalar_lea.sflag [#allocation4], %s2130_s26  ;;  %s1933_s16 = scalar_lea.vmem %s2766_s6, 6144 }
 0x4cc   : > { %s2764_s14 = scalar_lea.hbm %s2820_s1, %s1814_s30  ;;  %p1934_p8 = scmp.ne.s32.totalorder %s2766_s6, %s1933_s16 }
 0x4cd   : > { %s2016_s17 = smov [#allocation5]  }
 0x4ce   : > { %p1935_p10 = pnand %p1934_p8, %p2886_p11  ;;  %s1937_s22 = sshll.u32 %s2016_s17, 4  ;;  %s1938_s22 = int_to_ptr.vmem [resolvable:$false] %s1937_s22 }
 0x4cf   : > { %s1939_s23 = scalar_lea.vmem %s1938_s22, 12288  ;;  %p1940_p2 = scmp.lt.s32.totalorder %s2766_s6, %s1938_s22 }
 0x4d0   : > { %p1936_p0 = pneg %p1935_p10  ;;  %p1941_p4 = scmp.lt.s32.totalorder %s1939_s23, %s1933_s16 }
 0x4d2   : > { %p1942_p5 = por %p1941_p4, %p1940_p2 }
 0x4d4   : > { %p1943_p7 = pnand %p1942_p5, %p1936_p0 }
 0x582   : > { %v1739_v28 = vpop.f32.mrb[16].mxu1 }
 0x583   : > { %1507 = vst [vmem:[%s2663_s28 + $0xc8] sm:$0xff] %v1739_v28  ;;  %1515 = vst [vmem:[%s2663_s28 + $0x108] sm:$0xff] %v1739_v28  ;;  %v1202_v29 = vpop.f32.mrb[17].mxu1 }
 0x584   : > { %1523 = vst [vmem:[%s2663_s28 + $0x148] sm:$0xff] %v1739_v28  ;;  %1506 = vst [vmem:[%s2663_s28 + $0xc0] sm:$0xff] %v1202_v29 }
 0x585   : > { %1514 = vst [vmem:[%s2663_s28 + $0x100] sm:$0xff] %v1202_v29  ;;  %1522 = vst [vmem:[%s2663_s28 + $0x140] sm:$0xff] %v1202_v29 }
 0x586   : > { %v1742_v30 = vpop.f32.mrb[18].mxu1 }
 0x587   : > { %1509 = vst [vmem:[%s2663_s28 + $0xd8] sm:$0xff] %v1742_v30  ;;  %1517 = vst [vmem:[%s2663_s28 + $0x118] sm:$0xff] %v1742_v30  ;;  %v1212_v31 = vpop.f32.mrb[19].mxu1 }
 0x588   : > { %1525 = vst [vmem:[%s2663_s28 + $0x158] sm:$0xff] %v1742_v30  ;;  %1508 = vst [vmem:[%s2663_s28 + $0xd0] sm:$0xff] %v1212_v31 }
 0x589   : > { %1516 = vst [vmem:[%s2663_s28 + $0x110] sm:$0xff] %v1212_v31  ;;  %1524 = vst [vmem:[%s2663_s28 + $0x150] sm:$0xff] %v1212_v31 }
 0x58a   : > { %v1745_v32 = vpop.f32.mrb[20].mxu1 }
 0x58b   : > { %1511 = vst [vmem:[%s2663_s28 + $0xe8] sm:$0xff] %v1745_v32  ;;  %1519 = vst [vmem:[%s2663_s28 + $0x128] sm:$0xff] %v1745_v32  ;;  %v1222_v17 = vpop.f32.mrb[21].mxu1 }
 0x58c   : > { %1527 = vst [vmem:[%s2663_s28 + $0x168] sm:$0xff] %v1745_v32  ;;  %1510 = vst [vmem:[%s2663_s28 + $0xe0] sm:$0xff] %v1222_v17 }
 0x58d   : > { %1518 = vst [vmem:[%s2663_s28 + $0x120] sm:$0xff] %v1222_v17  ;;  %1526 = vst [vmem:[%s2663_s28 + $0x160] sm:$0xff] %v1222_v17 }
 0x58e   : > { %v1748_v35 = vpop.f32.mrb[22].mxu1 }
 0x58f   : > { %1513 = vst [vmem:[%s2663_s28 + $0xf8] sm:$0xff] %v1748_v35  ;;  %1521 = vst [vmem:[%s2663_s28 + $0x138] sm:$0xff] %v1748_v35  ;;  %v1232_v36 = vpop.f32.mrb[23].mxu1 }
 0x590   : > { %1529 = vst [vmem:[%s2663_s28 + $0x178] sm:$0xff] %v1748_v35  ;;  %1512 = vst [vmem:[%s2663_s28 + $0xf0] sm:$0xff] %v1232_v36 }
 0x591   : > { %1520 = vst [vmem:[%s2663_s28 + $0x130] sm:$0xff] %v1232_v36  ;;  %1528 = vst [vmem:[%s2663_s28 + $0x170] sm:$0xff] %v1232_v36 }
 0x592   : > { %1946 = shalt.err (!%p1943_p7)
}
 0x593   : > { %s1947_s28 = scalar_lea.hbm %s2764_s14, 6144  ;;  %s1951_s29 = scalar_lea.hbm %s2820_s1, 12288 }
 0x594   : > { %p1948_p9 = scmp.ne.s32.totalorder %s2764_s14, %s1947_s28  ;;  %p1952_p6 = scmp.lt.u32.totalorder %s2764_s14, %s2820_s1 }
 0x595   : > { %p1953_p12 = scmp.lt.u32.totalorder %s1951_s29, %s1947_s28  ;;  %p1955_p8 = scmp.lt.u32.totalorder %s1947_s28, %s2764_s14 }
 0x596   : > { %p1949_p1 = pnand %p1948_p9, %p2886_p11 }
 0x597   : > { %p1954_p13 = por %p1953_p12, %p1952_p6 }
 0x598   : > { %p1950_p3 = pneg %p1949_p1 }
 0x599   : > { %p1956_p10 = por %p1955_p8, %p1954_p13 }
 0x59b   : > { %p1957_p0 = pnand %p1956_p10, %p1950_p3 }
 0x59d   : > { %1960 = shalt.err (!%p1957_p0)
}
 0x59e   : > { %1817 = dma.vmem_to_hbm [thread:$0]  (%p2886_p11), %s2766_s6, 6144, %s2764_s14, %s1269_s13, %s2014_s27, %s2014_s27, %s2015_s3  }
 0x59f PF: > { %s1319_s19 = sand.u32 1, %s1991_s9   ;;  %p2887_p2 = scmp.ne.s32.totalorder %s2829_s21, 0 }
 0x5a0   : > { %p2888_p4 = scmp.ge.s32.totalorder %s2003_s12, 2  ;;  %s1320_s30 = scalar_lea.sflag [#allocation4], %s1319_s19 }
 0x5a2   : > { %p1826_p5 = pnand %p2888_p4, %p2887_p2 }
 0x5a4   : > { %1982 = dma.done.wait (!%p1826_p5), %s1320_s30, 6144  }
 0x5a5   : > { %1984 = vsyncadd (!%p1826_p5), %s1320_s30, 4294961152  ;;  %s1329_s20 = scalar_lea.sflag [#allocation7], %s1319_s19 }
 0x5a6   : > { %1986 = dma.done.wait (!%p1826_p5), %s1329_s20, 256  }
 0x5a7   : > { %1988 = vsyncadd (!%p1826_p5), %s1329_s20, 4294967040  ;;  %p19_p11 = scmp.ge.s32.totalorder %s2057_s15, 4   ;;  %s2889_s9 = smov %s1995_s10 }
 0x5a8   : > { %s2890_s10 = smov %s1999_s11  ;;  %s2891_s11 = smov %s2069_s18 }
 0x5a9   : > { %s2892_s12 = smov %s2057_s15  ;;  %21 = sbr.rel (!%p19_p11) target bundleno = 7 (0x7), region = 94 }
 0x5b0   :  { %1334 = vsyncpa [#allocation3], 1 }
 0x5b1   :  { %1336 = vsyncpa [#allocation3 + $0x1], 1 }
 0x5b2   :  { %1337 = vsyncpa [#allocation4], 1 }
 0x5b3   :  { %1339 = vsyncpa [#allocation4 + $0x1], 1 }
 0x5b4   :  { %1340 = vsyncpa [#allocation7], 1 }
 0x5b5   :  { %1342 = vsyncpa [#allocation7 + $0x1], 1 }

</bundles_post_ra>
